<compile_context>
chip_gen: v7x
topology: tpu7x:2x2x1
jax: 0.10.0
libtpu: 0.0.40
codegen_flags: <defaults>
</compile_context>

<pallas_src>
import functools

import jax
import jax.numpy as jnp
from jax.experimental import pallas as pl
from jax.experimental.pallas import tpu as pltpu


def _kd_kernel(pred_ref, soft_ref, out_ref, acc_ref, *,
               inv_temp, inv_total, hw, hw_tile, tiles_per_split, needs_mask):
    """One (image n, spatial-split s, spatial-tile t) step of the KD loss.

    acc_ref: (1, 1, hw_tile) f32 channel-reduced accumulator (reset at t==0).
    out_ref: (1, 1, 8, 128) f32 per-(image, split) partial, written at last t.
    Keyword constants are plain Python scalars (compile-time literals).
    """
    s_idx = pl.program_id(1)
    t_idx = pl.program_id(2)

    @pl.when(t_idx == 0)
    def _():
        acc_ref[...] = jnp.zeros_like(acc_ref)

    p = pred_ref[...].astype(jnp.float32)
    s = soft_ref[...].astype(jnp.float32)
    if inv_temp != 1.0:
        p = p * inv_temp
        s = s * inv_temp

    # log_softmax(pred / T) over channels (sublane axis, axis=1)
    p_max = jnp.max(p, axis=1, keepdims=True)
    p_sh = p - p_max
    log_p = p_sh - jnp.log(jnp.sum(jnp.exp(p_sh), axis=1, keepdims=True))

    # softmax(soft / T) over channels, plus its log (numerically stable)
    s_max = jnp.max(s, axis=1, keepdims=True)
    s_sh = s - s_max
    s_exp = jnp.exp(s_sh)
    s_sum = jnp.sum(s_exp, axis=1, keepdims=True)
    q = s_exp * pl.reciprocal(s_sum, approx=True)   # EUP, ~1e-3 rel err max
    log_q = s_sh - jnp.log(s_sum)

    # Pointwise KL term, reduced over channels -> (1, 1, hw_tile).
    kl_c = jnp.sum(q * (log_q - log_p), axis=1, keepdims=True)

    if needs_mask:
        # Lane-only mask applied after the channel reduce.  jnp.where is a
        # true select, so NaN/Inf from garbage lanes of the ragged (or fully
        # out-of-range duplicated) tile never reach the accumulator.
        col = jax.lax.broadcasted_iota(jnp.int32, (1, 1, hw_tile), 2)
        start = (s_idx * tiles_per_split + t_idx) * hw_tile
        kl_c = jnp.where(col < (hw - start), kl_c, 0.0)

    acc_ref[...] += kl_c

    @pl.when(t_idx == pl.num_programs(2) - 1)
    def _():
        partial = jnp.sum(acc_ref[...]) * inv_total
        out_ref[...] = jnp.full(out_ref.shape, partial, dtype=out_ref.dtype)


def criterion_kd(pred, soft, *, temperature=1.0, hw_tile=None,
                 spatial_splits=None):
    """JAX/Pallas equivalent of CriterionKD(upsample=False).forward([pred], [soft])."""
    # TODO(synk): upsample=True branch (bilinear x8, align_corners=True) not
    # implemented; the module default is upsample=False.
    N, C, H, W = pred.shape
    assert soft.shape == pred.shape
    HW = H * W
    itemsize = jnp.dtype(pred.dtype).itemsize

    # Sublane padding of the channel axis (packed dtypes pack along sublanes).
    sublane_pack = max(1, 4 // itemsize) * 8
    c_pad = ((C + sublane_pack - 1) // sublane_pack) * sublane_pack

    # Free reshape, no HBM transpose: channels on sublanes, H*W on lanes.
    pred3 = pred.reshape(N, C, HW)
    soft3 = soft.reshape(N, C, HW)

    # Lane-dense spatial tile targeting ~4 MiB per input block.
    if hw_tile is None:
        hw_tile = max(128, (4 * 1024 * 1024) // (c_pad * itemsize))
    hw_tile = min(int(hw_tile), HW)
    if hw_tile < HW:
        hw_tile = max(128, (hw_tile // 128) * 128)
        if hw_tile >= HW:
            hw_tile = HW

    # Double-buffered working set: 2 inputs x 2 buffers x padded block + acc.
    def _working_bytes(t):
        return 2 * 2 * c_pad * t * itemsize + 8 * t * 4

    vmem_budget = 44 * 1024 * 1024          # leave headroom under v7x's 64 MiB
    while hw_tile > 128 and _working_bytes(hw_tile) > vmem_budget:
        hw_tile = max(128, ((hw_tile // 2) // 128) * 128)

    num_hw_tiles = pl.cdiv(HW, hw_tile)

    # Second "parallel" grid axis over spatial halves: keeps the second
    # TensorCore (v7x) busy when N == 1.  Only auto-enabled when it adds no
    # (or little) padded work, so it is harmless on single-TC chips.
    if spatial_splits is None:
        spatial_splits = 2 if (N == 1 and num_hw_tiles >= 2 and
                               (num_hw_tiles % 2 == 0 or num_hw_tiles >= 8)) else 1
    n_split = int(spatial_splits)
    tiles_per_split = int(pl.cdiv(num_hw_tiles, n_split))
    needs_mask = (n_split * tiles_per_split * hw_tile) != HW
    max_tile_idx = num_hw_tiles - 1

    total_elems = N * C * H * W
    kernel = functools.partial(
        _kd_kernel,
        inv_temp=float(1.0 / temperature),
        inv_total=float(1.0 / total_elems),
        hw=int(HW),
        hw_tile=int(hw_tile),
        tiles_per_split=tiles_per_split,
        needs_mask=bool(needs_mask),
    )

    def in_index(n, s, t):
        # Clamp logical tile index so padded logical tiles (uneven split) DMA
        # an in-bounds block; their lanes are fully masked inside the kernel.
        j = jnp.minimum(s * tiles_per_split + t, max_tile_idx)
        return (n, 0, j)

    vmem_limit = int(min(64 * 1024 * 1024,
                         max(16 * 1024 * 1024,
                             _working_bytes(hw_tile) + (4 << 20))))

    partials = pl.pallas_call(
        kernel,
        out_shape=jax.ShapeDtypeStruct((N, n_split, 8, 128), jnp.float32),
        grid_spec=pltpu.PrefetchScalarGridSpec(
            num_scalar_prefetch=0,
            grid=(N, n_split, tiles_per_split),
            in_specs=[
                pl.BlockSpec((1, C, hw_tile), in_index),
                pl.BlockSpec((1, C, hw_tile), in_index),
            ],
            out_specs=pl.BlockSpec((1, 1, 8, 128), lambda n, s, t: (n, s, 0, 0)),
            scratch_shapes=[pltpu.VMEM((1, 1, hw_tile), jnp.float32)],
        ),
        compiler_params=pltpu.CompilerParams(
            dimension_semantics=("parallel", "parallel", "arbitrary"),
            vmem_limit_bytes=vmem_limit,
        ),
    )(pred3, soft3)

    # Each partial is already scaled by 1/(N*C*H*W); combine images/splits.
    return jnp.sum(partials[:, :, 0, 0])


def _reference_kd(pred, soft, temperature=1.0):
    """Pure-JAX reference mirroring PyTorch CriterionKD (KLDivLoss 'mean')."""
    log_p = jax.nn.log_softmax(pred / temperature, axis=1)
    q = jax.nn.softmax(soft / temperature, axis=1)
    log_q = jax.nn.log_softmax(soft / temperature, axis=1)
    kl = jnp.where(q > 0, q * (log_q - log_p), 0.0)
    return jnp.mean(kl)


if __name__ == "__main__":
    key = jax.random.PRNGKey(0)
    k1, k2, k3, k4 = jax.random.split(key, 4)

    # Case 1: module-default shapes (batch=2, channels=4, spatial=16x16).
    pred = jax.random.normal(k1, (2, 4, 16, 16), dtype=jnp.float32)
    soft = jax.random.normal(k2, (2, 4, 16, 16), dtype=jnp.float32)
    loss = jax.block_until_ready(criterion_kd(pred, soft, temperature=1.0))
    ref = jax.block_until_ready(_reference_kd(pred, soft, 1.0))
    assert jnp.allclose(loss, ref, atol=1e-3, rtol=1e-3), (loss, ref)

    # Case 2: exercises the ragged last tile + spatial-split parallel axis.
    pred2 = jax.random.normal(k3, (1, 5, 20, 20), dtype=jnp.float32)
    soft2 = jax.random.normal(k4, (1, 5, 20, 20), dtype=jnp.float32)
    loss2 = jax.block_until_ready(
        criterion_kd(pred2, soft2, temperature=2.0, hw_tile=128))
    ref2 = jax.block_until_ready(_reference_kd(pred2, soft2, 2.0))
    assert jnp.allclose(loss2, ref2, atol=1e-3, rtol=1e-3), (loss2, ref2)

    print("KERNEL_OK")
</pallas_src>

<mosaic_0001>
module attributes {stable_mosaic.version = 11 : i64} {
  func.func @_kd_kernel(%arg0: i32, %arg1: i32, %arg2: i32, %arg3: memref<1x4x256xf32, #tpu.memory_space<vmem>>, %arg4: memref<1x4x256xf32, #tpu.memory_space<vmem>>, %arg5: memref<1x1x8x128xf32, #tpu.memory_space<vmem>>, %arg6: memref<1x1x256xf32, #tpu.memory_space<vmem>>) attributes {dimension_semantics = [#tpu.dimension_semantics<parallel>, #tpu.dimension_semantics<parallel>, #tpu.dimension_semantics<arbitrary>], iteration_bounds = array<i64: 2, 1, 1>, scalar_prefetch = 0 : i64, scratch_operands = 1 : i64, tpu.core_type = #tpu.core_type<tc>, window_params = [{transform_indices = @transform_0, window_bounds = array<i64: 1, 4, 256>}, {transform_indices = @transform_1, window_bounds = array<i64: 1, 4, 256>}, {transform_indices = @transform_2, window_bounds = array<i64: 1, 1, 8, 128>}]} {
    %c0_i32 = arith.constant 0 : i32
    %0 = arith.cmpi eq, %arg2, %c0_i32 : i32
    %1 = arith.extui %0 : i1 to i32
    %c0_i32_0 = arith.constant 0 : i32
    %2 = arith.cmpi ne, %1, %c0_i32_0 : i32
    scf.if %2 {
      %cst_18 = arith.constant 0.000000e+00 : f32
      %38 = vector.broadcast %cst_18 : f32 to vector<1x1x256xf32>
      %c0_19 = arith.constant 0 : index
      %c0_20 = arith.constant 0 : index
      %c0_21 = arith.constant 0 : index
      %39 = vector.load %arg6[%c0_19, %c0_20, %c0_21] : memref<1x1x256xf32, #tpu.memory_space<vmem>>, vector<1x1x256xf32>
      tpu.vector_store %arg6[%c0_19, %c0_20, %c0_21], %38 {strides = array<i32>} : memref<1x1x256xf32, #tpu.memory_space<vmem>>, vector<1x1x256xf32>,
    } else {
    }
    %c0 = arith.constant 0 : index
    %c0_1 = arith.constant 0 : index
    %c0_2 = arith.constant 0 : index
    %3 = vector.load %arg3[%c0, %c0_1, %c0_2] : memref<1x4x256xf32, #tpu.memory_space<vmem>>, vector<1x4x256xf32>
    %c0_3 = arith.constant 0 : index
    %c0_4 = arith.constant 0 : index
    %c0_5 = arith.constant 0 : index
    %4 = vector.load %arg4[%c0_3, %c0_4, %c0_5] : memref<1x4x256xf32, #tpu.memory_space<vmem>>, vector<1x4x256xf32>
    %cst = arith.constant dense<0xFF800000> : vector<1x256xf32>
    %5 = vector.multi_reduction <maximumf>, %3, %cst [1] : vector<1x4x256xf32> to vector<1x256xf32>
    %6 = vector.shape_cast %5 : vector<1x256xf32> to vector<1x1x256xf32>
    %7 = vector.broadcast %6 : vector<1x1x256xf32> to vector<1x4x256xf32>
    %8 = arith.subf %3, %7 : vector<1x4x256xf32>
    %9 = math.exp %8 : vector<1x4x256xf32>
    %cst_6 = arith.constant dense<0.000000e+00> : vector<1x256xf32>
    %10 = vector.multi_reduction <add>, %9, %cst_6 [1] : vector<1x4x256xf32> to vector<1x256xf32>
    %11 = vector.shape_cast %10 : vector<1x256xf32> to vector<1x1x256xf32>
    %12 = math.log %11 : vector<1x1x256xf32>
    %13 = vector.broadcast %12 : vector<1x1x256xf32> to vector<1x4x256xf32>
    %14 = arith.subf %8, %13 : vector<1x4x256xf32>
    %cst_7 = arith.constant dense<0xFF800000> : vector<1x256xf32>
    %15 = vector.multi_reduction <maximumf>, %4, %cst_7 [1] : vector<1x4x256xf32> to vector<1x256xf32>
    %16 = vector.shape_cast %15 : vector<1x256xf32> to vector<1x1x256xf32>
    %17 = vector.broadcast %16 : vector<1x1x256xf32> to vector<1x4x256xf32>
    %18 = arith.subf %4, %17 : vector<1x4x256xf32>
    %19 = math.exp %18 : vector<1x4x256xf32>
    %cst_8 = arith.constant dense<0.000000e+00> : vector<1x256xf32>
    %20 = vector.multi_reduction <add>, %19, %cst_8 [1] : vector<1x4x256xf32> to vector<1x256xf32>
    %21 = vector.shape_cast %20 : vector<1x256xf32> to vector<1x1x256xf32>
    %22 = tpu.reciprocal %21 {approx = true} : vector<1x1x256xf32> -> vector<1x1x256xf32>
    %23 = vector.broadcast %22 : vector<1x1x256xf32> to vector<1x4x256xf32>
    %24 = arith.mulf %19, %23 : vector<1x4x256xf32>
    %25 = math.log %21 : vector<1x1x256xf32>
    %26 = vector.broadcast %25 : vector<1x1x256xf32> to vector<1x4x256xf32>
    %27 = arith.subf %18, %26 : vector<1x4x256xf32>
    %28 = arith.subf %27, %14 : vector<1x4x256xf32>
    %29 = arith.mulf %24, %28 : vector<1x4x256xf32>
    %cst_9 = arith.constant dense<0.000000e+00> : vector<1x256xf32>
    %30 = vector.multi_reduction <add>, %29, %cst_9 [1] : vector<1x4x256xf32> to vector<1x256xf32>
    %31 = vector.shape_cast %30 : vector<1x256xf32> to vector<1x1x256xf32>
    %c0_10 = arith.constant 0 : index
    %c0_11 = arith.constant 0 : index
    %c0_12 = arith.constant 0 : index
    %32 = vector.load %arg6[%c0_10, %c0_11, %c0_12] : memref<1x1x256xf32, #tpu.memory_space<vmem>>, vector<1x1x256xf32>
    %33 = arith.addf %32, %31 : vector<1x1x256xf32>
    %c0_13 = arith.constant 0 : index
    %c0_14 = arith.constant 0 : index
    %c0_15 = arith.constant 0 : index
    %34 = vector.load %arg6[%c0_13, %c0_14, %c0_15] : memref<1x1x256xf32, #tpu.memory_space<vmem>>, vector<1x1x256xf32>
    tpu.vector_store %arg6[%c0_13, %c0_14, %c0_15], %33 {strides = array<i32>} : memref<1x1x256xf32, #tpu.memory_space<vmem>>, vector<1x1x256xf32>,
    %c0_i32_16 = arith.constant 0 : i32
    %35 = arith.cmpi eq, %arg2, %c0_i32_16 : i32
    %36 = arith.extui %35 : i1 to i32
    %c0_i32_17 = arith.constant 0 : i32
    %37 = arith.cmpi ne, %36, %c0_i32_17 : i32
    scf.if %37 {
      %c0_18 = arith.constant 0 : index
      %c0_19 = arith.constant 0 : index
      %c0_20 = arith.constant 0 : index
      %38 = vector.load %arg6[%c0_18, %c0_19, %c0_20] : memref<1x1x256xf32, #tpu.memory_space<vmem>>, vector<1x1x256xf32>
      %39 = vector.shape_cast %38 : vector<1x1x256xf32> to vector<1x1x1x256xf32>
      %cst_21 = arith.constant dense<0.000000e+00> : vector<1xf32>
      %40 = vector.multi_reduction <add>, %39, %cst_21 [1, 2, 3] : vector<1x1x1x256xf32> to vector<1xf32>
      %41 = vector.shape_cast %40 : vector<1xf32> to vector<1x1x1x1xf32>
      %42 = vector.extract %41[0, 0, 0, 0] : f32 from vector<1x1x1x1xf32>
      %cst_22 = arith.constant 4.8828125E-4 : f32
      %43 = arith.mulf %42, %cst_22 : f32
      %44 = vector.broadcast %43 : f32 to vector<1x1x8x128xf32>
      %c0_23 = arith.constant 0 : index
      %c0_24 = arith.constant 0 : index
      %c0_25 = arith.constant 0 : index
      %c0_26 = arith.constant 0 : index
      %45 = vector.load %arg5[%c0_23, %c0_24, %c0_25, %c0_26] : memref<1x1x8x128xf32, #tpu.memory_space<vmem>>, vector<1x1x8x128xf32>
      tpu.vector_store %arg5[%c0_23, %c0_24, %c0_25, %c0_26], %44 {strides = array<i32>} : memref<1x1x8x128xf32, #tpu.memory_space<vmem>>, vector<1x1x8x128xf32>,
    } else {
    }
    return
  }
  func.func @transform_0(%arg0: i32, %arg1: i32, %arg2: i32) -> (i32, i32, i32) {
    %c1_i32 = arith.constant 1 : i32
    %0 = arith.muli %arg1, %c1_i32 : i32
    %1 = arith.addi %0, %arg2 : i32
    %c0_i32 = arith.constant 0 : i32
    %2 = arith.minsi %1, %c0_i32 : i32
    %c0_i32_0 = arith.constant 0 : i32
    %c0_i32_1 = arith.constant 0 : i32
    return %arg0, %c0_i32_0, %2 : i32, i32, i32
  }
  func.func @transform_1(%arg0: i32, %arg1: i32, %arg2: i32) -> (i32, i32, i32) {
    %c1_i32 = arith.constant 1 : i32
    %0 = arith.muli %arg1, %c1_i32 : i32
    %1 = arith.addi %0, %arg2 : i32
    %c0_i32 = arith.constant 0 : i32
    %2 = arith.minsi %1, %c0_i32 : i32
    %c0_i32_0 = arith.constant 0 : i32
    %c0_i32_1 = arith.constant 0 : i32
    return %arg0, %c0_i32_0, %2 : i32, i32, i32
  }
  func.func @transform_2(%arg0: i32, %arg1: i32, %arg2: i32) -> (i32, i32, i32, i32) {
    %c0_i32 = arith.constant 0 : i32
    %c0_i32_0 = arith.constant 0 : i32
    %c0_i32_1 = arith.constant 0 : i32
    return %arg0, %arg1, %c0_i32, %c0_i32_0 : i32, i32, i32, i32
  }
}

</mosaic_0001>

<bundles_post_ra>
// kernel: tpu_custom_call.1
= control target key start
LH: loop header
LB: loop body
LE: loop exit
PB: predicated region body
PF: predicated region fallthrough
CT: control target
= control target key end

     0   :  { %7 = vsyncpa [#allocation4], 0  ;;  %s1095_s0 = inlined_call_operand.hbm [shape: f32[2,4,256], index: 0, kind: input, shape index: {}]   ;;  %s1096_s1 = inlined_call_operand.hbm [shape: f32[2,4,256], index: 1, kind: input, shape index: {}]   ;;  %s1097_s2 = inlined_call_operand.hbm [shape: f32[2,1,8,128], index: 2, kind: output, shape index: {}]  }
   0x1   :  { %9 = vsyncpa [#allocation4 + $0x1], 0 }
   0x2   :  { %10 = vsyncpa [#allocation7], 0 }
   0x3   :  { %12 = vsyncpa [#allocation7 + $0x1], 0 }
   0x4   :  { %13 = vsyncpa [#allocation5], 0 }
   0x5   :  { %15 = vsyncpa [#allocation5 + $0x1], 0  ;;  %s850_s9 = smov 0   ;;  %s852_s10 = smov 0  }
   0x6   :  { %s854_s11 = smov 0   ;;  %s856_s12 = smov 0  }
   0x7   :  { %s858_s13 = smov 0   ;;  %s860_s14 = smov 0  }
   0x8 LB: > { %s573_s15 = sadd.s32 4294967295, %s828_s14   ;;  %s574_s16 = sadd.s32 4294967294, %s828_s14   ;;  %s828_s14 = sphi %s860_s14, %s21_s14   ;;  %s824_s13 = sphi %s858_s13, %s1119_s13   ;;  %s820_s12 = sphi %s856_s12, %s1118_s12   ;;  %s816_s11 = sphi %s854_s11, %s1117_s11   ;;  %s812_s10 = sphi %s852_s10, %s1116_s10   ;;  %s808_s9 = sphi %s850_s9, %s1115_s9  }
   0x9   : > { %s40_s17 = sadd.s32 1, %s824_s13  ;;  %s55_s18 = sadd.s32 1, %s816_s11 }
   0xa   : > { %p42_p0 = scmp.ge.s32.totalorder %s40_s17, 2  ;;  %p62_p1 = scmp.ne.s32.totalorder %s816_s11, %s812_s10 }
   0xb   : > { %p63_p2 = scmp.eq.s32.totalorder %s828_s14, 0  ;;  %p68_p3 = scmp.ne.s32.totalorder %s812_s10, %s808_s9 }
   0xc   : > { %s1121_s17 = smov (%p42_p0, %s40_s17), 0  ;;  %p69_p5 = scmp.eq.s32.totalorder %s573_s15, 0 }
   0xd   : > { %p891_p4 = por %p63_p2, %p62_p1  ;;  %s50_s20 = ssub.s32 %s824_s13, %s1121_s17 }
   0xe   : > { %p128_p6 = scmp.eq.s32.totalorder %s573_s15, 1  ;;  %p53_p7 = scmp.eq.s32.totalorder %s50_s20, 0 }
   0xf   : > { %p897_p8 = por %p69_p5, %p68_p3  ;;  %p134_p10 = scmp.eq.s32.totalorder %s574_s16, 1 }
  0x10   : > { %p901_p9 = por %p128_p6, %p62_p1  ;;  %p612_p13 = scmp.lt.s32.totalorder %s828_s14, 2 }
  0x11   : > { %s1101_s21 = scalar_select %p897_p8, 1, 0 }
  0x12   : > { %s1102_s22 = scalar_select %p901_p9, 1, 0 }
  0x13   : > { %s906_s23 = scalar_select %p53_p7, %s816_s11, %s55_s18  }
  0x14   : > { %p908_p11 = por %p134_p10, %p68_p3  ;;  %s915_s25 = sand.u32 1, %s816_s11  }
  0x15   : > { %s577_s26 = sshll.u32 %s915_s25, 3  ;;  %s591_s27 = sshll.u32 %s824_s13, 7 }
  0x16   : > { %s1103_s24 = scalar_select %p908_p11, 1, 0 }
  0x17   : > { %s924_s30 = scalar_lea.hbm %s1095_s0, %s591_s27  ;;  %s158_s3 = scalar_lea.vmem [#allocation3], %s577_s26 }
  0x18   : > { %s171_s4 = sshll.u32 %s158_s3, 4  ;;  %p932_p0 = pnand %p612_p13, %p891_p4  ;;  %s928_s4 = int_to_ptr.vmem [resolvable:$true] %s171_s4 }
  0x19   : > { %s155_s6 = scalar_lea.sflag [#allocation4], %s915_s25  ;;  %s682_s7 = scalar_lea.hbm %s924_s30, 128 }
  0x1a   : > { %p683_p3 = scmp.ne.s32.totalorder %s924_s30, %s682_s7  ;;  %p684_p5 = pneg %p932_p0 }
  0x1b   : > { %s687_s16 = scalar_lea.hbm %s1095_s0, 256  ;;  %p688_p4 = scmp.lt.u32.totalorder %s924_s30, %s1095_s0 }
  0x1c   : > { %p685_p6 = pnand %p684_p5, %p683_p3  ;;  %p689_p10 = scmp.lt.u32.totalorder %s687_s16, %s682_s7 }
  0x1d   : > { %p691_p12 = scmp.lt.u32.totalorder %s682_s7, %s924_s30 }
  0x1e   : > { %p686_p7 = pneg %p685_p6  ;;  %p690_p13 = por %p689_p10, %p688_p4 }
  0x20   : > { %p692_p1 = por %p691_p12, %p690_p13 }
  0x22   : > { %p693_p2 = pnand %p692_p1, %p686_p7 }
  0x24   : > { %696 = shalt.err (!%p693_p2)
}
  0x25   : > { %s697_s20 = scalar_lea.vmem %s928_s4, 128  ;;  %s830_s28 = smov [#allocation3]  }
  0x26   : > { %p698_p3 = scmp.ne.s32.totalorder %s928_s4, %s697_s20  ;;  %s702_s29 = sshll.u32 %s830_s28, 4  ;;  %s703_s29 = int_to_ptr.vmem [resolvable:$false] %s702_s29 }
  0x27   : > { %s704_s3 = scalar_lea.vmem %s703_s29, 256  ;;  %p705_p9 = scmp.lt.s32.totalorder %s928_s4, %s703_s29 }
  0x28   : > { %p700_p6 = pnand %p698_p3, %p684_p5  ;;  %p706_p4 = scmp.lt.s32.totalorder %s704_s3, %s697_s20 }
  0x2a   : > { %p701_p11 = pneg %p700_p6  ;;  %p707_p10 = por %p706_p4, %p705_p9 }
  0x2c   : > { %p708_p12 = pnand %p707_p10, %p701_p11 }
  0x2e   : > { %711 = shalt.err (!%p708_p12)
}
  0x2f   : > { %604 = dma.hbm_to_vmem [thread:$0]  (!%p932_p0), %s924_s30, 128, %s928_s4, %s155_s6  }
  0x30   : > { %p1105_p1 = scmp.lt.s32.totalorder %s828_s14, 3  ;;  %p1106_p2 = scmp.ge.s32.totalorder %s828_s14, 1 }
  0x31   : > { %s977_s16 = scalar_lea.hbm %s1096_s1, %s591_s27  ;;  %s182_s18 = scalar_lea.vmem [#allocation6], %s577_s26 }
  0x32   : > { %p968_p7 = pnand %p1106_p2, %p1105_p1  ;;  %s195_s19 = sshll.u32 %s182_s18, 4  ;;  %s196_s19 = int_to_ptr.vmem [resolvable:$true] %s195_s19 }
  0x33   : > { %s179_s30 = scalar_lea.sflag [#allocation7], %s915_s25  ;;  %s712_s4 = scalar_lea.hbm %s977_s16, 128 }
  0x34   : > { %s1107_s7 = scalar_select %p968_p7, 1, 0 }
  0x35   : > { %p713_p9 = scmp.ne.s32.totalorder %s977_s16, %s712_s4  ;;  %s717_s27 = scalar_lea.hbm %s1096_s1, 256 }
  0x36   : > { %p718_p3 = scmp.lt.u32.totalorder %s977_s16, %s1096_s1  ;;  %p719_p6 = scmp.lt.u32.totalorder %s717_s27, %s712_s4 }
  0x37   : > { %p715_p11 = pnand %p713_p9, %p684_p5  ;;  %p721_p10 = scmp.lt.u32.totalorder %s712_s4, %s977_s16 }
  0x38   : > { %p720_p4 = por %p719_p6, %p718_p3 }
  0x39   : > { %p716_p13 = pneg %p715_p11 }
  0x3a   : > { %p722_p12 = por %p721_p10, %p720_p4 }
  0x3c   : > { %p723_p1 = pnand %p722_p12, %p716_p13 }
  0x3e   : > { %726 = shalt.err (!%p723_p1)
}
  0x3f   : > { %s727_s25 = scalar_lea.vmem %s196_s19, 128  ;;  %s831_s26 = smov [#allocation6]  }
  0x40   : > { %p728_p2 = scmp.ne.s32.totalorder %s196_s19, %s727_s25  ;;  %s732_s3 = sshll.u32 %s831_s26, 4  ;;  %s733_s3 = int_to_ptr.vmem [resolvable:$false] %s732_s3 }
  0x41   : > { %s734_s8 = scalar_lea.vmem %s733_s3, 256  ;;  %p735_p8 = scmp.lt.s32.totalorder %s196_s19, %s733_s3 }
  0x42   : > { %p730_p9 = pnand %p728_p2, %p684_p5  ;;  %p736_p7 = scmp.lt.s32.totalorder %s734_s8, %s727_s25 }
  0x44   : > { %p731_p11 = pneg %p730_p9  ;;  %p737_p3 = por %p736_p7, %p735_p8 }
  0x46   : > { %p738_p6 = pnand %p737_p3, %p731_p11 }
  0x48   : > { %741 = shalt.err (!%p738_p6)
}
  0x49   : > { %607 = dma.hbm_to_vmem [thread:$0]  (!%p932_p0), %s977_s16, 128, %s196_s19, %s179_s30  }
  0x4a   : > { %p1108_p13 = scmp.ne.s32.totalorder %s1107_s7, 0 }
  0x4b   : > { %s1004_s15 = sand.u32 (!%p1108_p13), 1, %s812_s10   ;;  %p1109_p8 = scmp.ne.s32.totalorder (!%p1108_p13), %s1101_s21, 0 }
  0x4c   : > { %204 = sbr.rel (%p1108_p13) target bundleno = 415 (0x19f), region = 28  ;;  %s1007_s18 = sshll.u32 (!%p1108_p13), %s1004_s15, 3 }
  0x4d   : > { %s207_s4 = scalar_lea.sflag (!%p1108_p13), [#allocation4], %s1004_s15  ;;  %s210_s6 = scalar_lea.vmem (!%p1108_p13), [#allocation3], %s1007_s18 }
  0x53   : > { %795 = dma.done.wait (%p1109_p8), %s207_s4, 128  }
  0x54   : > { %797 = vsyncadd (%p1109_p8), %s207_s4, 4294967168  ;;  %s216_s5 = scalar_lea.sflag [#allocation7], %s1004_s15  ;;  %s219_s7 = scalar_lea.vmem [#allocation6], %s1007_s18 }
  0x55   : > { %799 = dma.done.wait (%p1109_p8), %s216_s5, 128  }
  0x56   : > { %801 = vsyncadd (%p1109_p8), %s216_s5, 4294967168  ;;  %v257_v0 = vlaneseq  ;;  %v832_v2 = vmov 0.0   ;;  %vm267_vm1 = vcmask 1043456   ;;  %v262_v3 = vld [vmem:[%s210_s6] sm:$0xff]  ;;  %v263_v4 = vld [vmem:[%s219_s7] sm:$0xff]  ;;  %vm431_vm2 = vcmask 1040384  }
  0x57   : > { %v265_v5 = vcombine.high %v262_v3, %v262_v3  ;;  %v268_v6 = vsel %vm267_vm1, %v262_v3, -inf  ;;  %v316_v7 = vcombine.high %v263_v4, %v263_v4  ;;  %v318_v8 = vsel %vm267_vm1, %v263_v4, -inf  ;;  %s244_s21 = scalar_lea.vmem [#allocation8], %s1007_s18  ;;  %s588_s19 = sshll.u32 %s820_s12, 7 }
  0x58   : > { %vm1022_vm0 = vcmp.lt.s32.totalorder %v257_v0, 256  ;;  %v269_v9 = vrot.slane %v268_v6, 4  ;;  %v319_v10 = vrot.slane %v318_v8, 4  ;;  %s462_s16 = sshll.u32 %s244_s21, 4  ;;  %s1046_s29 = scalar_lea.hbm %s1097_s2, %s588_s19  ;;  %s1048_s16 = int_to_ptr.vmem [resolvable:$true] %s462_s16 }
  0x59   : > { %261 = vst.msk [vmem:[#allocation2] sm:$0x3] %vm1022_vm0, %v832_v2  ;;  %v275_v11 = vsel %vm267_vm1, %v265_v5, -inf  ;;  %v325_v12 = vsel %vm267_vm1, %v316_v7, -inf  ;;  %s448_s25 = scalar_lea.sflag [#allocation5], %s1004_s15  ;;  %s742_s26 = scalar_lea.vmem %s1048_s16, 128 }
  0x5a   : > { %v270_v13 = vmax.f32 %v268_v6, %v269_v9  ;;  %v276_v14 = vrot.slane %v275_v11, 4  ;;  %v320_v15 = vmax.f32 %v318_v8, %v319_v10  ;;  %v326_v16 = vrot.slane %v325_v12, 4  ;;  %p743_p0 = scmp.ne.s32.totalorder %s1048_s16, %s742_s26  ;;  %p1112_p5 = scmp.ne.s32.totalorder %s1102_s22, 0 }
  0x5b   : > { %s834_s12 = smov [#allocation8]  }
  0x5c   : > { %v271_v17 = vrot.slane %v270_v13, 2  ;;  %v277_v18 = vmax.f32 %v275_v11, %v276_v14  ;;  %v321_v19 = vrot.slane %v320_v15, 2  ;;  %v327_v20 = vmax.f32 %v325_v12, %v326_v16  ;;  %p744_p7 = pnand %p743_p0, %p1112_p5  ;;  %s746_s3 = sshll.u32 %s834_s12, 4  ;;  %s747_s3 = int_to_ptr.vmem [resolvable:$false] %s746_s3 }
  0x5d   : > { %s748_s8 = scalar_lea.vmem %s747_s3, 256  ;;  %p749_p10 = scmp.lt.s32.totalorder %s1048_s16, %s747_s3 }
  0x5e   : > { %v272_v21 = vmax.f32 %v270_v13, %v271_v17  ;;  %v278_v22 = vrot.slane %v277_v18, 2  ;;  %v322_v23 = vmax.f32 %v320_v15, %v321_v19  ;;  %v328_v24 = vrot.slane %v327_v20, 2  ;;  %p745_p4 = pneg %p744_p7  ;;  %p750_p12 = scmp.lt.s32.totalorder %s748_s8, %s742_s26 }
  0x60   : > { %v273_v25 = vrot.slane %v272_v21, 1  ;;  %v279_v26 = vmax.f32 %v277_v18, %v278_v22  ;;  %v323_v27 = vrot.slane %v322_v23, 1  ;;  %v329_v28 = vmax.f32 %v327_v20, %v328_v24  ;;  %p751_p1 = por %p750_p12, %p749_p10 }
  0x62   : > { %v274_v29 = vmax.f32 %v272_v21, %v273_v25  ;;  %v280_v30 = vrot.slane %v279_v26, 1  ;;  %v324_v31 = vmax.f32 %v322_v23, %v323_v27  ;;  %v330_v32 = vrot.slane %v329_v28, 1  ;;  %p752_p2 = pnand %p751_p1, %p745_p4 }
  0x64   : > { %v281_v33 = vmax.f32 %v279_v26, %v280_v30  ;;  %v331_v34 = vmax.f32 %v329_v28, %v330_v32 }
  0x66   : > { %v284_v35 = vcombine.low %v274_v29, %v281_v33  ;;  %v334_v36 = vcombine.low %v324_v31, %v331_v34 }
  0x68   : > { %v286_v37 = vsub.f32 %v262_v3, %v284_v35  ;;  %v336_v38 = vsub.f32 %v263_v4, %v334_v36 }
  0x6a   : > { %v287_v39 = vmul.f32 1.442695, %v286_v37  ;;  %v337_v40 = vmul.f32 1.442695, %v336_v38 }
  0x6c   : > { %666 = vpow2.f32 %v287_v39  ;;  %v833_v39 = vmov 1966171168  }
  0x6d   : > { %668 = vpow2.f32 %v337_v40  ;;  %v396_v40 = vunpack.c.l.s4 %v833_v39 }
  0x76   : > { %v667_v41 = vpop.eup %666 }
  0x77   : > { %v669_v42 = vpop.eup %668  ;;  %v290_v43 = vcombine.high %v667_v41, %v667_v41  ;;  %v292_v44 = vsel %vm267_vm1, %v667_v41, 0.0 }
  0x78   : > { %v293_v45 = vrot.slane %v292_v44, 4  ;;  %v340_v46 = vcombine.high %v669_v42, %v669_v42  ;;  %v342_v47 = vsel %vm267_vm1, %v669_v42, 0.0 }
  0x79   : > { %v299_v48 = vsel %vm267_vm1, %v290_v43, 0.0  ;;  %v343_v49 = vrot.slane %v342_v47, 4 }
  0x7a   : > { %v294_v50 = vadd.f32 %v293_v45, %v292_v44  ;;  %v300_v51 = vrot.slane %v299_v48, 4  ;;  %v349_v52 = vsel %vm267_vm1, %v340_v46, 0.0 }
  0x7b   : > { %v344_v53 = vadd.f32 %v343_v49, %v342_v47  ;;  %v350_v54 = vrot.slane %v349_v52, 4 }
  0x7c   : > { %v295_v55 = vrot.slane %v294_v50, 2  ;;  %v301_v56 = vadd.f32 %v300_v51, %v299_v48  ;;  %v391_v51 = vld [vmem:[#allocation2] sm:$0x3] }
  0x7d   : > { %v345_v57 = vrot.slane %v344_v53, 2  ;;  %v351_v58 = vadd.f32 %v350_v54, %v349_v52 }
  0x7e   : > { %v296_v59 = vadd.f32 %v295_v55, %v294_v50  ;;  %v302_v60 = vrot.slane %v301_v56, 2 }
  0x7f   : > { %v346_v61 = vadd.f32 %v345_v57, %v344_v53  ;;  %v352_v62 = vrot.slane %v351_v58, 2 }
  0x80   : > { %v297_v63 = vrot.slane %v296_v59, 1  ;;  %v303_v2 = vadd.f32 %v302_v60, %v301_v56 }
  0x81   : > { %v347_v3 = vrot.slane %v346_v61, 1  ;;  %v353_v4 = vadd.f32 %v352_v62, %v351_v58 }
  0x82   : > { %v298_v5 = vadd.f32 %v297_v63, %v296_v59  ;;  %v304_v6 = vrot.slane %v303_v2, 1 }
  0x83   : > { %v348_v7 = vadd.f32 %v347_v3, %v346_v61  ;;  %v354_v8 = vrot.slane %v353_v4, 1 }
  0x84   : > { %v305_v9 = vadd.f32 %v304_v6, %v303_v2  ;;  %670 = vlog2.f32 %v298_v5 }
  0x85   : > { %v355_v10 = vadd.f32 %v354_v8, %v353_v4  ;;  %672 = vrcp.f32 %v348_v7 }
  0x86   : > { %674 = vlog2.f32 %v305_v9 }
  0x87   : > { %676 = vrcp.f32 %v355_v10 }
  0x88   : > { %678 = vlog2.f32 %v348_v7 }
  0x89   : > { %680 = vlog2.f32 %v355_v10 }
  0x8e   : > { %v671_v11 = vpop.eup %670 }
  0x8f   : > { %v673_v12 = vpop.eup %672  ;;  %v307_v13 = vmul.f32 0.6931472, %v671_v11 }
  0x90   : > { %v675_v14 = vpop.eup %674 }
  0x91   : > { %v677_v15 = vpop.eup %676  ;;  %v309_v16 = vmul.f32 0.6931472, %v675_v14 }
  0x92   : > { %v679_v17 = vpop.eup %678  ;;  %v360_v21 = vcombine.low %v673_v12, %v677_v15 }
  0x93   : > { %v681_v18 = vpop.eup %680  ;;  %v312_v19 = vcombine.low %v307_v13, %v309_v16  ;;  %v364_v20 = vmul.f32 0.6931472, %v679_v17 }
  0x94   : > { %v366_v22 = vmul.f32 0.6931472, %v681_v18  ;;  %v362_v25 = vmul.f32 %v669_v42, %v360_v21  ;;  %v397_v42 = vunpack.c.0.s8 %v396_v40 }
  0x95   : > { %v314_v23 = vsub.f32 %v286_v37, %v312_v19 }
  0x96   : > { %v369_v24 = vcombine.low %v364_v20, %v366_v22 }
  0x98   : > { %v371_v26 = vsub.f32 %v336_v38, %v369_v24  ;;  %v399_v38 = vshrl.u32 %v257_v0, 7 }
  0x9a   : > { %v372_v27 = vsub.f32 %v371_v26, %v314_v23  ;;  %v400_v48 = vsub.s32 %v397_v42, %v399_v38  ;;  %v423_v54 = vsub.s32 0, %v399_v38  ;;  %v427_v55 = vsub.s32 1, %v399_v38 }
  0x9c   : > { %v373_v28 = vmul.f32 %v372_v27, %v362_v25 }
  0x9e   : > { %v375_v29 = vcombine.high %v373_v28, %v373_v28  ;;  %v377_v30 = vsel %vm267_vm1, %v373_v28, 0.0 }
  0x9f   : > { %v378_v31 = vrot.slane %v377_v30, 4 }
  0xa0   : > { %v384_v32 = vsel %vm267_vm1, %v375_v29, 0.0 }
  0xa1   : > { %v379_v33 = vadd.f32 %v378_v31, %v377_v30  ;;  %v385_v34 = vrot.slane %v384_v32, 4 }
  0xa3   : > { %v380_v35 = vrot.slane %v379_v33, 2  ;;  %v386_v36 = vadd.f32 %v385_v34, %v384_v32 }
  0xa5   : > { %v381_v41 = vadd.f32 %v380_v35, %v379_v33  ;;  %v387_v43 = vrot.slane %v386_v36, 2 }
  0xa7   : > { %v382_v37 = vrot.slane %v381_v41, 1  ;;  %v388_v44 = vadd.f32 %v387_v43, %v386_v36 }
  0xa9   : > { %v383_v45 = vadd.f32 %v382_v37, %v381_v41  ;;  %v389_v46 = vrot.slane %v388_v44, 1 }
  0xab   : > { %v390_v47 = vadd.f32 %v389_v46, %v388_v44 }
  0xad   : > { %v394_v49 = vcombine.low %v383_v45, %v390_v47 }
  0xaf   : > { %v401_v50 = vrot.slane %v394_v49, %v400_v48 }
  0xb1   : > { %v408_v52 = vrot.slane %v401_v50, %v400_v48 }
  0xb3   : > { %v410_v53 = vadd.f32 %v408_v52, %v391_v51 }
  0xb5   : > { %415 = vst.msk [vmem:[#allocation2] sm:$0x3] %vm1022_vm0, %v410_v53 }
  0xbc   : > { %v419_v56 = vld [vmem:[#allocation2] sm:$0x3] }
  0xbd   : > { %v424_v57 = vrot.slane %v419_v56, %v423_v54  ;;  %v428_v0 = vrot.slane %v419_v56, %v427_v55 }
  0xbf   : > { %v432_v58 = vsel %vm431_vm2, %v424_v57, 0.0  ;;  %v433_v59 = vsel %vm431_vm2, %v428_v0, 0.0 }
  0xc0   : > { %v434_v60 = vadd.f32 %v433_v59, %v432_v58 }
  0xc2   : > { %435 = vadd.xlane.f32.xlu0 %v434_v60 }
 0x14f   : > { %v436_v61 = vpop.xlane.xlu0 %435 }
 0x150   : > { %v437_v62 = vrot.slane %v436_v61, 4 }
 0x152   : > { %v438_v63 = vadd.f32 %v437_v62, %v436_v61 }
 0x154   : > { %v439_v2 = vrot.slane %v438_v63, 2 }
 0x156   : > { %v440_v3 = vadd.f32 %v439_v2, %v438_v63 }
 0x158   : > { %v441_v1 = vrot.slane %v440_v3, 1 }
 0x15a   : > { %v442_v4 = vadd.f32 %v441_v1, %v440_v3 }
 0x15c   : > { %593 = vpush %v442_v4 }
 0x18d   : > { %s594_s30 = spop %593 }
 0x18e   : > { %s444_s20 = smul.f32 0.00048828125, %s594_s30 }
 0x190   : > { %v445_v5 = vstv %s444_s20 }
 0x191   : > { %446 = vst [vmem:[%s244_s21] sm:$0xff] %v445_v5 }
 0x192   : > { %755 = shalt.err (!%p752_p2)
}
 0x193   : > { %s756_s15 = scalar_lea.hbm %s1046_s29, 128  ;;  %s760_s6 = scalar_lea.hbm %s1097_s2, 256 }
 0x194   : > { %p757_p9 = scmp.ne.s32.totalorder %s1046_s29, %s756_s15  ;;  %p761_p6 = scmp.lt.u32.totalorder %s1046_s29, %s1097_s2 }
 0x195   : > { %p762_p13 = scmp.lt.u32.totalorder %s760_s6, %s756_s15  ;;  %p764_p0 = scmp.lt.u32.totalorder %s756_s15, %s1046_s29 }
 0x196   : > { %p758_p11 = pnand %p757_p9, %p1112_p5 }
 0x197   : > { %p763_p8 = por %p762_p13, %p761_p6 }
 0x198   : > { %p759_p3 = pneg %p758_p11 }
 0x199   : > { %p765_p7 = por %p764_p0, %p763_p8 }
 0x19b   : > { %p766_p4 = pnand %p765_p7, %p759_p3 }
 0x19d   : > { %769 = shalt.err (!%p766_p4)
}
 0x19e   : > { %599 = dma.vmem_to_hbm [thread:$0]  (%p1112_p5), %s1048_s16, 128, %s1046_s29, %s448_s25  }
 0x19f PF: > { %s474_s21 = sand.u32 1, %s808_s9   ;;  %p1113_p10 = scmp.ne.s32.totalorder %s1103_s24, 0 }
 0x1a0   : > { %p1114_p12 = scmp.ge.s32.totalorder %s828_s14, 2  ;;  %s475_s19 = scalar_lea.sflag [#allocation5], %s474_s21 }
 0x1a2   : > { %p609_p1 = pnand %p1114_p12, %p1113_p10 }
 0x1a4   : > { %803 = dma.done.wait (!%p609_p1), %s475_s19, 128  }
 0x1a5   : > { %805 = vsyncadd (!%p609_p1), %s475_s19, 4294967168  ;;  %s21_s14 = sadd.s32 1, %s828_s14   ;;  %s1115_s9 = smov %s812_s10 }
 0x1a6   : > { %p18_p2 = scmp.ge.s32.totalorder %s21_s14, 4   ;;  %s1116_s10 = smov %s816_s11 }
 0x1a7   : > { %s1117_s11 = smov %s906_s23  ;;  %s1118_s12 = smov %s824_s13 }
 0x1a8   : > { %s1119_s13 = smov %s1121_s17  ;;  %20 = sbr.rel (!%p18_p2) target bundleno = 8 (0x8), region = 94 }
 0x1af   :  { %480 = vsyncpa [#allocation4], 1 }
 0x1b0   :  { %482 = vsyncpa [#allocation4 + $0x1], 1 }
 0x1b1   :  { %483 = vsyncpa [#allocation7], 1 }
 0x1b2   :  { %485 = vsyncpa [#allocation7 + $0x1], 1 }
 0x1b3   :  { %486 = vsyncpa [#allocation5], 1 }
 0x1b4   :  { %488 = vsyncpa [#allocation5 + $0x1], 1 }

</bundles_post_ra>
